<compile_context>
chip_gen: v7x
topology: tpu7x:2x2x1
jax: 0.10.0
libtpu: 0.0.40
codegen_flags: <defaults>
</compile_context>

<pallas_src>
import functools

import jax
import jax.numpy as jnp
from jax.experimental import pallas as pl
from jax.experimental.pallas import tpu as pltpu


def _round_up(x, m):
    return ((x + m - 1) // m) * m


def mlp_kernel(x_ref, w1_ref, b1_ref, w2_ref, b2_ref, w3_ref, b3_ref, o_ref):
    # Layer 1: bf16 MXU matmul, f32 accumulation; bias + ReLU in bf16
    # (bf16 VALU processes 2x elements/vreg on v6e/v7x).
    h1 = jnp.dot(x_ref[...], w1_ref[...], preferred_element_type=jnp.float32)
    h1 = jnp.maximum(h1.astype(jnp.bfloat16) + b1_ref[...], 0)
    # Layer 2
    h2 = jnp.dot(h1, w2_ref[...], preferred_element_type=jnp.float32)
    h2 = jnp.maximum(h2.astype(jnp.bfloat16) + b2_ref[...], 0)
    # Output layer (N padded to 128 -> lane-dense unmasked vst; padded
    # columns are exact zeros and sliced away by the wrapper).
    o = jnp.dot(h2, w3_ref[...], preferred_element_type=jnp.float32)
    o_ref[...] = (o.astype(jnp.bfloat16) + b3_ref[...]).astype(o_ref.dtype)


def prepare_params(w1, b1, w2, b2, w3, b3):
    """One-time prep: cast weights/biases to bf16, lane-pad the output layer.

    Call once and reuse the result for every net_forward call, so per-call
    HBM traffic is limited to x and the output.  Weights are expected already
    transposed to (in, out) layout, i.e. the kernel computes x @ W + b.
    """
    h1 = w1.shape[1]
    h2 = w2.shape[1]
    out_f = w3.shape[1]
    n_pad = _round_up(out_f, 128)

    w1b = w1.astype(jnp.bfloat16)
    w2b = w2.astype(jnp.bfloat16)
    w3p = jnp.zeros((w3.shape[0], n_pad), jnp.bfloat16).at[:, :out_f].set(
        w3.astype(jnp.bfloat16))
    b1b = b1.reshape(1, h1).astype(jnp.bfloat16)
    b2b = b2.reshape(1, h2).astype(jnp.bfloat16)
    b3p = jnp.zeros((1, n_pad), jnp.bfloat16).at[:, :out_f].set(
        b3.reshape(1, out_f).astype(jnp.bfloat16))
    return (w1b, b1b, w2b, b2b, w3p, b3p)


def net_forward(x, params, *, out_features, block_b=2048):
    """y = out(relu(hidder2(relu(hidder1(x))))) matching PyTorch Net."""
    w1b, b1b, w2b, b2b, w3p, b3p = params
    B, in_f = x.shape
    H1 = w1b.shape[1]
    H2 = w2b.shape[1]
    Np = w3p.shape[1]

    # Batch tiling: large tiles amortize per-grid-step overhead; pick TB as
    # round_up(cdiv(B, num_tiles), 16) to avoid pathological batch padding
    # and keep bf16 sublane packing dense.  For larger batches force >=2
    # tiles so the "parallel" axis can use both v7x TensorCores.
    num_tiles = pl.cdiv(B, block_b)
    if num_tiles == 1 and B >= 64:
        num_tiles = 2
    TB = _round_up(pl.cdiv(B, num_tiles), 16)
    Bp = _round_up(B, TB)
    grid = Bp // TB

    # Only x-dependent per-call prep: bf16 cast (+ batch pad when needed).
    # No K padding: BlockSpec last dim == full array dim (in_f) is legal and
    # the MXU pays one full-depth pass regardless.
    xb = x.astype(jnp.bfloat16)
    if Bp != B:
        xb = jnp.pad(xb, ((0, Bp - B), (0, 0)))

    flops = 2 * Bp * (in_f * H1 + H1 * H2 + H2 * Np)
    bytes_accessed = (
        xb.size * 2
        + (w1b.size + w2b.size + w3p.size) * 2
        + (b1b.size + b2b.size + b3p.size) * 2
        + Bp * Np * 2
    )

    out = pl.pallas_call(
        mlp_kernel,
        out_shape=jax.ShapeDtypeStruct((Bp, Np), jnp.bfloat16),
        grid_spec=pltpu.PrefetchScalarGridSpec(
            num_scalar_prefetch=0,
            grid=(grid,),
            in_specs=[
                pl.BlockSpec((TB, in_f), lambda i: (i, 0)),   # x tiles stream
                pl.BlockSpec((in_f, H1), lambda i: (0, 0)),   # weights resident
                pl.BlockSpec((1, H1), lambda i: (0, 0)),
                pl.BlockSpec((H1, H2), lambda i: (0, 0)),
                pl.BlockSpec((1, H2), lambda i: (0, 0)),
                pl.BlockSpec((H2, Np), lambda i: (0, 0)),
                pl.BlockSpec((1, Np), lambda i: (0, 0)),
            ],
            out_specs=pl.BlockSpec((TB, Np), lambda i: (i, 0)),
        ),
        compiler_params=pltpu.CompilerParams(
            dimension_semantics=("parallel",),  # shard batch tiles across TCs
            # Large batch tiles exceed v5e's 16 MiB scoped-VMEM default; 48 MiB
            # still fits comfortably under v7x's 64 MiB physical VMEM.
            vmem_limit_bytes=48 * 1024 * 1024,
        ),
        cost_estimate=pl.CostEstimate(
            flops=flops, bytes_accessed=bytes_accessed, transcendentals=0
        ),
    )(xb, w1b, b1b, w2b, b2b, w3p, b3p)

    # Strip batch / output-lane padding; return f32 to match the module.
    return out[:B, :out_features].astype(jnp.float32)


def init_linear(key, in_f, out_f):
    # PyTorch Linear default init: U(-1/sqrt(in_f), 1/sqrt(in_f)) for W and b.
    kw, kb = jax.random.split(key)
    bound = 1.0 / jnp.sqrt(jnp.float32(in_f))
    # Stored already transposed: (in_f, out_f) so the kernel does x @ W + b.
    w = jax.random.uniform(kw, (in_f, out_f), jnp.float32, -bound, bound)
    b = jax.random.uniform(kb, (out_f,), jnp.float32, -bound, bound)
    return w, b


if __name__ == "__main__":
    in_feature, out_feature = 32, 16
    batch = 8

    key = jax.random.PRNGKey(0)
    kx, k1, k2, k3 = jax.random.split(key, 4)

    x = jax.random.normal(kx, (batch, in_feature), jnp.float32)
    w1, b1 = init_linear(k1, in_feature, 512)
    w2, b2 = init_linear(k2, 512, 256)
    w3, b3 = init_linear(k3, 256, out_feature)

    # One-time parameter prep; reuse `params` across all forward calls.
    params = prepare_params(w1, b1, w2, b2, w3, b3)
    fwd = jax.jit(functools.partial(net_forward, out_features=out_feature))

    out = jax.block_until_ready(fwd(x, params))

    # Pure-JAX reference following the same bf16-weight / f32-accumulate /
    # bf16-epilogue path as the kernel.
    xb = x.astype(jnp.bfloat16)
    w1b, w2b, w3b = (w.astype(jnp.bfloat16) for w in (w1, w2, w3))
    b1b, b2b, b3b = (b.astype(jnp.bfloat16) for b in (b1, b2, b3))
    h1 = jnp.maximum(
        jnp.dot(xb, w1b, preferred_element_type=jnp.float32).astype(jnp.bfloat16)
        + b1b, 0)
    h2 = jnp.maximum(
        jnp.dot(h1, w2b, preferred_element_type=jnp.float32).astype(jnp.bfloat16)
        + b2b, 0)
    ref = (jnp.dot(h2, w3b, preferred_element_type=jnp.float32).astype(jnp.bfloat16)
           + b3b).astype(jnp.float32)

    assert out.shape == (batch, out_feature)
    assert jnp.allclose(out, ref, atol=2e-2, rtol=2e-2), float(
        jnp.max(jnp.abs(out - ref)))

    print("KERNEL_OK")
</pallas_src>

<mosaic_0001>
module attributes {stable_mosaic.version = 11 : i64} {
  func.func @mlp_kernel(%arg0: i32, %arg1: memref<16x32xbf16, #tpu.memory_space<vmem>>, %arg2: memref<32x512xbf16, #tpu.memory_space<vmem>>, %arg3: memref<1x512xbf16, #tpu.memory_space<vmem>>, %arg4: memref<512x256xbf16, #tpu.memory_space<vmem>>, %arg5: memref<1x256xbf16, #tpu.memory_space<vmem>>, %arg6: memref<256x128xbf16, #tpu.memory_space<vmem>>, %arg7: memref<1x128xbf16, #tpu.memory_space<vmem>>, %arg8: memref<16x128xbf16, #tpu.memory_space<vmem>>) attributes {dimension_semantics = [#tpu.dimension_semantics<parallel>], iteration_bounds = array<i64: 1>, scalar_prefetch = 0 : i64, scratch_operands = 0 : i64, tpu.core_type = #tpu.core_type<tc>, window_params = [{transform_indices = @transform_0, window_bounds = array<i64: 16, 32>}, {pipeline_mode = #tpu.pipeline_mode<synchronous>, transform_indices = @transform_1, window_bounds = array<i64: 32, 512>}, {pipeline_mode = #tpu.pipeline_mode<synchronous>, transform_indices = @transform_2, window_bounds = array<i64: 1, 512>}, {pipeline_mode = #tpu.pipeline_mode<synchronous>, transform_indices = @transform_3, window_bounds = array<i64: 512, 256>}, {pipeline_mode = #tpu.pipeline_mode<synchronous>, transform_indices = @transform_4, window_bounds = array<i64: 1, 256>}, {pipeline_mode = #tpu.pipeline_mode<synchronous>, transform_indices = @transform_5, window_bounds = array<i64: 256, 128>}, {pipeline_mode = #tpu.pipeline_mode<synchronous>, transform_indices = @transform_6, window_bounds = array<i64: 1, 128>}, {transform_indices = @transform_7, window_bounds = array<i64: 16, 128>}]} {
    %c0 = arith.constant 0 : index
    %c0_0 = arith.constant 0 : index
    %0 = vector.load %arg1[%c0, %c0_0] : memref<16x32xbf16, #tpu.memory_space<vmem>>, vector<16x32xbf16>
    %c0_1 = arith.constant 0 : index
    %c0_2 = arith.constant 0 : index
    %1 = vector.load %arg2[%c0_1, %c0_2] : memref<32x512xbf16, #tpu.memory_space<vmem>>, vector<32x512xbf16>
    %cst = arith.constant dense<0.000000e+00> : vector<16x512xf32>
    %2 = tpu.matmul %0, %1, %cst {dimension_numbers = #tpu.dot_dimension_numbers<[1], [0], [0], [1], [0, 0, 1, 1], [], []>} : vector<16x32xbf16>, vector<32x512xbf16>, vector<16x512xf32> -> vector<16x512xf32>
    %3 = arith.truncf %2 : vector<16x512xf32> to vector<16x512xbf16>
    %c0_3 = arith.constant 0 : index
    %c0_4 = arith.constant 0 : index
    %4 = vector.load %arg3[%c0_3, %c0_4] : memref<1x512xbf16, #tpu.memory_space<vmem>>, vector<1x512xbf16>
    %5 = vector.broadcast %4 : vector<1x512xbf16> to vector<16x512xbf16>
    %6 = arith.addf %3, %5 : vector<16x512xbf16>
    %cst_5 = arith.constant 0.000000e+00 : bf16
    %7 = vector.broadcast %cst_5 : bf16 to vector<16x512xbf16>
    %8 = arith.maximumf %6, %7 : vector<16x512xbf16>
    %c0_6 = arith.constant 0 : index
    %c0_7 = arith.constant 0 : index
    %9 = vector.load %arg4[%c0_6, %c0_7] : memref<512x256xbf16, #tpu.memory_space<vmem>>, vector<512x256xbf16>
    %cst_8 = arith.constant dense<0.000000e+00> : vector<16x256xf32>
    %10 = tpu.matmul %8, %9, %cst_8 {dimension_numbers = #tpu.dot_dimension_numbers<[1], [0], [0], [1], [0, 0, 1, 1], [], []>} : vector<16x512xbf16>, vector<512x256xbf16>, vector<16x256xf32> -> vector<16x256xf32>
    %11 = arith.truncf %10 : vector<16x256xf32> to vector<16x256xbf16>
    %c0_9 = arith.constant 0 : index
    %c0_10 = arith.constant 0 : index
    %12 = vector.load %arg5[%c0_9, %c0_10] : memref<1x256xbf16, #tpu.memory_space<vmem>>, vector<1x256xbf16>
    %13 = vector.broadcast %12 : vector<1x256xbf16> to vector<16x256xbf16>
    %14 = arith.addf %11, %13 : vector<16x256xbf16>
    %cst_11 = arith.constant 0.000000e+00 : bf16
    %15 = vector.broadcast %cst_11 : bf16 to vector<16x256xbf16>
    %16 = arith.maximumf %14, %15 : vector<16x256xbf16>
    %c0_12 = arith.constant 0 : index
    %c0_13 = arith.constant 0 : index
    %17 = vector.load %arg6[%c0_12, %c0_13] : memref<256x128xbf16, #tpu.memory_space<vmem>>, vector<256x128xbf16>
    %cst_14 = arith.constant dense<0.000000e+00> : vector<16x128xf32>
    %18 = tpu.matmul %16, %17, %cst_14 {dimension_numbers = #tpu.dot_dimension_numbers<[1], [0], [0], [1], [0, 0, 1, 1], [], []>} : vector<16x256xbf16>, vector<256x128xbf16>, vector<16x128xf32> -> vector<16x128xf32>
    %19 = arith.truncf %18 : vector<16x128xf32> to vector<16x128xbf16>
    %c0_15 = arith.constant 0 : index
    %c0_16 = arith.constant 0 : index
    %20 = vector.load %arg7[%c0_15, %c0_16] : memref<1x128xbf16, #tpu.memory_space<vmem>>, vector<1x128xbf16>
    %21 = vector.broadcast %20 : vector<1x128xbf16> to vector<16x128xbf16>
    %22 = arith.addf %19, %21 : vector<16x128xbf16>
    %c0_17 = arith.constant 0 : index
    %c0_18 = arith.constant 0 : index
    %23 = vector.load %arg8[%c0_17, %c0_18] : memref<16x128xbf16, #tpu.memory_space<vmem>>, vector<16x128xbf16>
    tpu.vector_store %arg8[%c0_17, %c0_18], %22 {strides = array<i32>} : memref<16x128xbf16, #tpu.memory_space<vmem>>, vector<16x128xbf16>,
    return
  }
  func.func @transform_0(%arg0: i32) -> (i32, i32) {
    %c0_i32 = arith.constant 0 : i32
    %c0_i32_0 = arith.constant 0 : i32
    return %arg0, %c0_i32 : i32, i32
  }
  func.func @transform_1(%arg0: i32) -> (i32, i32) {
    %c0_i32 = arith.constant 0 : i32
    %c0_i32_0 = arith.constant 0 : i32
    %c0_i32_1 = arith.constant 0 : i32
    return %c0_i32, %c0_i32_0 : i32, i32
  }
  func.func @transform_2(%arg0: i32) -> (i32, i32) {
    %c0_i32 = arith.constant 0 : i32
    %c0_i32_0 = arith.constant 0 : i32
    %c0_i32_1 = arith.constant 0 : i32
    return %c0_i32, %c0_i32_0 : i32, i32
  }
  func.func @transform_3(%arg0: i32) -> (i32, i32) {
    %c0_i32 = arith.constant 0 : i32
    %c0_i32_0 = arith.constant 0 : i32
    %c0_i32_1 = arith.constant 0 : i32
    return %c0_i32, %c0_i32_0 : i32, i32
  }
  func.func @transform_4(%arg0: i32) -> (i32, i32) {
    %c0_i32 = arith.constant 0 : i32
    %c0_i32_0 = arith.constant 0 : i32
    %c0_i32_1 = arith.constant 0 : i32
    return %c0_i32, %c0_i32_0 : i32, i32
  }
  func.func @transform_5(%arg0: i32) -> (i32, i32) {
    %c0_i32 = arith.constant 0 : i32
    %c0_i32_0 = arith.constant 0 : i32
    %c0_i32_1 = arith.constant 0 : i32
    return %c0_i32, %c0_i32_0 : i32, i32
  }
  func.func @transform_6(%arg0: i32) -> (i32, i32) {
    %c0_i32 = arith.constant 0 : i32
    %c0_i32_0 = arith.constant 0 : i32
    %c0_i32_1 = arith.constant 0 : i32
    return %c0_i32, %c0_i32_0 : i32, i32
  }
  func.func @transform_7(%arg0: i32) -> (i32, i32) {
    %c0_i32 = arith.constant 0 : i32
    %c0_i32_0 = arith.constant 0 : i32
    return %arg0, %c0_i32 : i32, i32
  }
}

</mosaic_0001>

<bundles_post_ra>
// kernel: net_forward.1
= control target key start
LH: loop header
LB: loop body
LE: loop exit
PB: predicated region body
PF: predicated region fallthrough
CT: control target
= control target key end

     0   :  { %12 = vsyncpa [#allocation3], 0  ;;  %s1444_s0 = inlined_call_operand.vmem [shape: bf16[16,32], index: 0, kind: input, shape index: {}]   ;;  %s1445_s1 = inlined_call_operand.hbm [shape: bf16[32,512], index: 1, kind: input, shape index: {}]   ;;  %s1446_s2 = inlined_call_operand.vmem [shape: bf16[1,512], index: 2, kind: input, shape index: {}]   ;;  %s1447_s3 = inlined_call_operand.hbm [shape: bf16[512,256], index: 3, kind: input, shape index: {}]   ;;  %s1448_s4 = inlined_call_operand.vmem [shape: bf16[1,256], index: 4, kind: input, shape index: {}]   ;;  %s1449_s5 = inlined_call_operand.hbm [shape: bf16[256,128], index: 5, kind: input, shape index: {}]   ;;  %s1450_s6 = inlined_call_operand.vmem [shape: bf16[1,128], index: 6, kind: input, shape index: {}]   ;;  %s1451_s7 = inlined_call_operand.vmem [shape: bf16[16,128], index: 7, kind: output, shape index: {}]  }
   0x1   :  { %13 = vsyncpa [#allocation5], 0  ;;  %s1314_s24 = smov [#allocation4]   ;;  %s1244_s28 = scalar_lea.hbm %s1447_s3, 8192 }
   0x2   :  { %s35_s25 = sshll.u32 %s1314_s24, 4  ;;  %p1245_p0 = scmp.ne.s32.totalorder %s1447_s3, %s1244_s28  ;;  %s36_s25 = int_to_ptr.vmem [resolvable:$true] %s35_s25 }
   0x3   :  { %p1248_p1 = scmp.lt.u32.totalorder %s1244_s28, %s1447_s3 }
   0x5   :  { %p1250_p2 = pnand %p1248_p1, %p1245_p0 }
   0x7   :  { %1253 = shalt.err (!%p1250_p2)
}
   0x8   :  { %s1254_s10 = scalar_lea.vmem %s36_s25, 8192  ;;  %p1259_p4 = scmp.lt.s32.totalorder %s36_s25, %s36_s25 }
   0x9   :  { %p1255_p3 = scmp.ne.s32.totalorder %s36_s25, %s1254_s10  ;;  %p1260_p5 = scmp.lt.s32.totalorder %s1254_s10, %s1254_s10 }
   0xb   :  { %p1261_p6 = por %p1260_p5, %p1259_p4 }
   0xd   :  { %p1262_p7 = pnand %p1261_p6, %p1255_p3 }
   0xf   :  { %1265 = shalt.err (!%p1262_p7)
}
  0x10   :  { %s1315_s11 = smov 128   ;;  %s1316_s12 = smov 8  }
  0x11   :  { %41 = dma.hbm_to_vmem [thread:$0]  %s1447_s3, 8192, %s36_s25, [#allocation5], %s1315_s11, %s1315_s11, %s1316_s12  }
  0x12   :  { %s1317_s15 = smov [#allocation2]   ;;  %s1266_s19 = scalar_lea.hbm %s1445_s1, 1024 }
  0x13   :  { %s21_s16 = sshll.u32 %s1317_s15, 4  ;;  %p1267_p8 = scmp.ne.s32.totalorder %s1445_s1, %s1266_s19  ;;  %s22_s16 = int_to_ptr.vmem [resolvable:$true] %s21_s16 }
  0x14   :  { %p1270_p9 = scmp.lt.u32.totalorder %s1266_s19, %s1445_s1 }
  0x16   :  { %p1272_p10 = pnand %p1270_p9, %p1267_p8 }
  0x18   :  { %1275 = shalt.err (!%p1272_p10)
}
  0x19   :  { %s1276_s24 = scalar_lea.vmem %s22_s16, 1024  ;;  %p1281_p12 = scmp.lt.s32.totalorder %s22_s16, %s22_s16 }
  0x1a   :  { %p1277_p11 = scmp.ne.s32.totalorder %s22_s16, %s1276_s24  ;;  %p1282_p13 = scmp.lt.s32.totalorder %s1276_s24, %s1276_s24 }
  0x1c   :  { %p1283_p0 = por %p1282_p13, %p1281_p12 }
  0x1e   :  { %p1284_p1 = pnand %p1283_p0, %p1277_p11 }
  0x20   :  { %1287 = shalt.err (!%p1284_p1)
}
  0x21   :  { %s1318_s3 = smov 256   ;;  %s1319_s25 = smov 16  }
  0x22   :  { %27 = dma.hbm_to_vmem [thread:$0]  %s1445_s1, 1024, %s22_s16, [#allocation3], %s1318_s3, %s1318_s3, %s1319_s25  }
  0x23   :  { %s1320_s28 = smov [#allocation6]   ;;  %s1288_s9 = scalar_lea.hbm %s1449_s5, 2048 }
  0x24   :  { %s49_s29 = sshll.u32 %s1320_s28, 4  ;;  %p1289_p2 = scmp.ne.s32.totalorder %s1449_s5, %s1288_s9  ;;  %s50_s29 = int_to_ptr.vmem [resolvable:$true] %s49_s29 }
  0x25   :  { %p1292_p3 = scmp.lt.u32.totalorder %s1288_s9, %s1449_s5 }
  0x27   :  { %p1294_p4 = pnand %p1292_p3, %p1289_p2 }
  0x29   :  { %1297 = shalt.err (!%p1294_p4)
}
  0x2a   :  { %s1298_s14 = scalar_lea.vmem %s50_s29, 2048  ;;  %p1303_p6 = scmp.lt.s32.totalorder %s50_s29, %s50_s29 }
  0x2b   :  { %p1299_p5 = scmp.ne.s32.totalorder %s50_s29, %s1298_s14  ;;  %p1304_p7 = scmp.lt.s32.totalorder %s1298_s14, %s1298_s14 }
  0x2d   :  { %p1305_p8 = por %p1304_p7, %p1303_p6 }
  0x2f   :  { %p1306_p9 = pnand %p1305_p8, %p1299_p5 }
  0x31   :  { %1309 = shalt.err (!%p1306_p9)
}
  0x32   :  { %s1321_s1 = smov 64   ;;  %s1322_s15 = smov 4  }
  0x33   :  { %55 = dma.hbm_to_vmem [thread:$0]  %s1449_s5, 2048, %s50_s29, [#allocation5], %s1321_s1, %s1321_s1, %s1322_s15  }
  0x34   :  { %1310 = dma.done.wait [#allocation3], 1024  }
  0x35   :  { %1311 = vsyncadd [#allocation3], 4294966272 }
  0x36   :  { %1312 = dma.done.wait [#allocation5], 10240  }
  0x37   :  { %1313 = vsyncadd [#allocation5], 4294957056  ;;  %v1323_v0 = vmov 0   ;;  %v1119_v1 = vld [vmem:[#allocation2 + $0x4] ss:$16 sps:$4 sm:$0xff]   ;;  %vm123_vm0 = vcmask 261120  }
  0x38   :  { %159 = vmatprep.mubr.bf16.mxu0 %v1323_v0  ;;  %v1121_v2 = vld [vmem:[#allocation2] ss:$16 sps:$4 sm:$0xff]   ;;  %127 = vmatprep.subr.bf16.mxu0 %v1119_v1  ;;  %v1122_v3 = vld [vmem:[#allocation2 + $0x24] ss:$16 sps:$4 sm:$0xff]   ;;  %v1128_v5 = vld [vmem:[#allocation2 + $0xc] ss:$16 sps:$4 sm:$0xff]  }
  0x39   :  { %128 = vmatpush1.bf16.msra.mxu0 %v1121_v2  ;;  %v1124_v4 = vld [vmem:[#allocation2 + $0x20] ss:$16 sps:$4 sm:$0xff]   ;;  %v1126_v7 = vld [vmem:[#allocation2 + $0x8] ss:$16 sps:$4 sm:$0xff]   ;;  %v1132_v8 = vld [vmem:[#allocation4 + $0x4] ss:$8 sps:$4 sm:$0xff]  }
  0x3a   :  { %129 = vmatprep.subr.bf16.mxu0 %v1122_v3  ;;  %v1125_v6 = vld [vmem:[%s1444_s0] sm:$0xff]   ;;  %v1131_v10 = vld [vmem:[#allocation2 + $0x2c] ss:$16 sps:$4 sm:$0xff]   ;;  %663 = vmatprep.subr.bf16.mxu1 %v1132_v8  ;;  %v1137_v12 = vld [vmem:[#allocation4 + $0x10] ss:$8 sps:$4 sm:$0xff]  }
  0x3b   :  { %v1134_v9 = vld [vmem:[#allocation4] ss:$8 sps:$4 sm:$0xff]   ;;  %v1135_v11 = vld [vmem:[#allocation4 + $0x14] ss:$8 sps:$4 sm:$0xff]   ;;  %v1138_v14 = vld [vmem:[#allocation4 + $0x24] ss:$8 sps:$4 sm:$0xff]  }
  0x3c   :  { %664 = vmatpush1.bf16.msra.mxu1 %v1134_v9  ;;  %v1129_v13 = vld [vmem:[#allocation2 + $0x28] ss:$16 sps:$4 sm:$0xff]   ;;  %v1142_v15 = vld [vmem:[#allocation4 + $0x104] ss:$8 sps:$4 sm:$0xff]   ;;  %v1144_v18 = vld [vmem:[#allocation4 + $0x34] ss:$8 sps:$4 sm:$0xff]  }
  0x3d   :  { %130 = vmatpush1.bf16.msra.mxu0 %v1124_v4  ;;  %665 = vmatprep.subr.bf16.mxu1 %v1135_v11  ;;  %v1140_v16 = vld [vmem:[#allocation4 + $0x100] ss:$8 sps:$4 sm:$0xff]   ;;  %v1148_v19 = vld [vmem:[#allocation4 + $0x114] ss:$8 sps:$4 sm:$0xff]   ;;  %v1149_v20 = vld [vmem:[#allocation4 + $0x30] ss:$8 sps:$4 sm:$0xff]  }
  0x3e   :  { %170 = vmatprep.subr.bf16.mxu0 %v1128_v5  ;;  %v1143_v17 = vld [vmem:[#allocation4 + $0x20] ss:$8 sps:$4 sm:$0xff]   ;;  %v1146_v21 = vld [vmem:[#allocation4 + $0x110] ss:$8 sps:$4 sm:$0xff]   ;;  %v1150_v22 = vld [vmem:[#allocation4 + $0x44] ss:$8 sps:$4 sm:$0xff]  }
  0x3f   :  { %v1154_v23 = vld [vmem:[#allocation4 + $0x124] ss:$8 sps:$4 sm:$0xff]   ;;  %v1152_v24 = vld [vmem:[#allocation4 + $0x120] ss:$8 sps:$4 sm:$0xff]   ;;  %v1156_v26 = vld [vmem:[#allocation4 + $0x54] ss:$8 sps:$4 sm:$0xff]  }
  0x40   :  { %996 = vmatmul.mubr.msk.bf16.vlgmr.msra.gmra.mrb[0].mxu0 %vm123_vm0, %v1125_v6  ;;  %666 = vmatpush1.bf16.msra.mxu1 %v1137_v12  ;;  %v1155_v25 = vld [vmem:[#allocation4 + $0x40] ss:$8 sps:$4 sm:$0xff]   ;;  %v1160_v27 = vld [vmem:[#allocation4 + $0x134] ss:$8 sps:$4 sm:$0xff]   ;;  %v1161_v28 = vld [vmem:[#allocation4 + $0x50] ss:$8 sps:$4 sm:$0xff]  }
  0x41   :  { %171 = vmatpush1.bf16.msra.mxu0 %v1126_v7  ;;  %202 = vmatprep.mubr.bf16.mxu0 %v1323_v0  ;;  %v1158_v29 = vld [vmem:[#allocation4 + $0x130] ss:$8 sps:$4 sm:$0xff]   ;;  %v1162_v30 = vld [vmem:[#allocation4 + $0x64] ss:$8 sps:$4 sm:$0xff]   ;;  %v1164_v32 = vld [vmem:[#allocation4 + $0x140] ss:$8 sps:$4 sm:$0xff]  }
  0x42   :  { %172 = vmatprep.subr.bf16.mxu0 %v1131_v10  ;;  %667 = vmatprep.subr.bf16.mxu1 %v1138_v14  ;;  %v1166_v31 = vld [vmem:[#allocation4 + $0x144] ss:$8 sps:$4 sm:$0xff]   ;;  %v1167_v33 = vld [vmem:[#allocation4 + $0x60] ss:$8 sps:$4 sm:$0xff]   ;;  %v1168_v34 = vld [vmem:[#allocation4 + $0x74] ss:$8 sps:$4 sm:$0xff]   ;;  %v230_v14 = vlaneseq }
  0x43   :  { %v1172_v35 = vld [vmem:[#allocation4 + $0x154] ss:$8 sps:$4 sm:$0xff]   ;;  %v1173_v36 = vld [vmem:[#allocation4 + $0x70] ss:$8 sps:$4 sm:$0xff]   ;;  %v1174_v38 = vld [vmem:[#allocation4 + $0x84] ss:$8 sps:$4 sm:$0xff]  }
  0x44   :  { %668 = vmatpush1.bf16.msra.mxu1 %v1143_v17  ;;  %v1170_v37 = vld [vmem:[#allocation4 + $0x150] ss:$8 sps:$4 sm:$0xff]   ;;  %v1178_v39 = vld [vmem:[#allocation4 + $0x164] ss:$8 sps:$4 sm:$0xff]   ;;  %v1176_v40 = vld [vmem:[#allocation4 + $0x160] ss:$8 sps:$4 sm:$0xff]  }
  0x45   :  { %173 = vmatpush1.bf16.msra.mxu0 %v1129_v13  ;;  %669 = vmatprep.subr.bf16.mxu1 %v1144_v18  ;;  %v1179_v41 = vld [vmem:[#allocation4 + $0x80] ss:$8 sps:$4 sm:$0xff]   ;;  %v1180_v42 = vld [vmem:[#allocation4 + $0x94] ss:$8 sps:$4 sm:$0xff]   ;;  %v1185_v44 = vld [vmem:[#allocation4 + $0x90] ss:$8 sps:$4 sm:$0xff]  }
  0x46   :  { %706 = vmatprep.subr.bf16.mxu0 %v1142_v15  ;;  %v1184_v43 = vld [vmem:[#allocation4 + $0x174] ss:$8 sps:$4 sm:$0xff]   ;;  %v1182_v45 = vld [vmem:[#allocation4 + $0x170] ss:$8 sps:$4 sm:$0xff]   ;;  %v1186_v46 = vld [vmem:[#allocation4 + $0xa4] ss:$8 sps:$4 sm:$0xff]  }
  0x47   :  { %v1190_v47 = vld [vmem:[#allocation4 + $0x184] ss:$8 sps:$4 sm:$0xff]   ;;  %v1191_v48 = vld [vmem:[#allocation4 + $0xa0] ss:$8 sps:$4 sm:$0xff]   ;;  %v1192_v50 = vld [vmem:[#allocation4 + $0xb4] ss:$8 sps:$4 sm:$0xff]  }
  0x48   :  { %997 = vmatmul.mubr.msk.bf16.vlgmr.msra.gmra.mrb[4].mxu0 %vm123_vm0, %v1125_v6  ;;  %670 = vmatpush1.bf16.msra.mxu1 %v1149_v20  ;;  %v1188_v49 = vld [vmem:[#allocation4 + $0x180] ss:$8 sps:$4 sm:$0xff]   ;;  %v1196_v51 = vld [vmem:[#allocation4 + $0x194] ss:$8 sps:$4 sm:$0xff]   ;;  %v1197_v52 = vld [vmem:[#allocation4 + $0xb0] ss:$8 sps:$4 sm:$0xff]  }
  0x49   :  { %707 = vmatpush1.bf16.msra.mxu0 %v1140_v16  ;;  %671 = vmatprep.subr.bf16.mxu1 %v1150_v22  ;;  %v1194_v53 = vld [vmem:[#allocation4 + $0x190] ss:$8 sps:$4 sm:$0xff]   ;;  %v1198_v54 = vld [vmem:[#allocation4 + $0xc4] ss:$8 sps:$4 sm:$0xff]   ;;  %v1203_v56 = vld [vmem:[#allocation4 + $0xc0] ss:$8 sps:$4 sm:$0xff]  }
  0x4a   :  { %708 = vmatprep.subr.bf16.mxu0 %v1148_v19  ;;  %v1202_v55 = vld [vmem:[#allocation4 + $0x1a4] ss:$8 sps:$4 sm:$0xff]   ;;  %v1200_v57 = vld [vmem:[#allocation4 + $0x1a0] ss:$8 sps:$4 sm:$0xff]   ;;  %v1204_v58 = vld [vmem:[#allocation4 + $0xd4] ss:$8 sps:$4 sm:$0xff]  }
  0x4b   :  { %v1208_v59 = vld [vmem:[#allocation4 + $0x1b4] ss:$8 sps:$4 sm:$0xff]   ;;  %v1206_v60 = vld [vmem:[#allocation4 + $0x1b0] ss:$8 sps:$4 sm:$0xff]   ;;  %v1210_v62 = vld [vmem:[#allocation4 + $0xe4] ss:$8 sps:$4 sm:$0xff]  }
  0x4c   :  { %672 = vmatpush1.bf16.msra.mxu1 %v1155_v25  ;;  %v1209_v61 = vld [vmem:[#allocation4 + $0xd0] ss:$8 sps:$4 sm:$0xff]   ;;  %v1214_v63 = vld [vmem:[#allocation4 + $0x1c4] ss:$8 sps:$4 sm:$0xff]   ;;  %v1212_v1 = vld [vmem:[#allocation4 + $0x1c0] ss:$8 sps:$4 sm:$0xff]  }
  0x4d   :  { %709 = vmatpush1.bf16.msra.mxu0 %v1146_v21  ;;  %673 = vmatprep.subr.bf16.mxu1 %v1156_v26  ;;  %v1215_v2 = vld [vmem:[#allocation4 + $0xe0] ss:$8 sps:$4 sm:$0xff]   ;;  %v1216_v3 = vld [vmem:[#allocation4 + $0xf4] ss:$8 sps:$4 sm:$0xff]   ;;  %v1218_v4 = vld [vmem:[#allocation4 + $0x1d0] ss:$8 sps:$4 sm:$0xff]  }
  0x4e   :  { %710 = vmatprep.subr.bf16.mxu0 %v1154_v23  ;;  %v1220_v5 = vld [vmem:[#allocation4 + $0x1d4] ss:$8 sps:$4 sm:$0xff]   ;;  %v1221_v6 = vld [vmem:[#allocation4 + $0xf0] ss:$8 sps:$4 sm:$0xff]   ;;  %v1224_v7 = vld [vmem:[#allocation4 + $0x1e4] ss:$8 sps:$4 sm:$0xff]  }
  0x4f   :  { %v1222_v8 = vld [vmem:[#allocation4 + $0x1e0] ss:$8 sps:$4 sm:$0xff]   ;;  %v1227_v9 = vld [vmem:[#allocation4 + $0x1f4] ss:$8 sps:$4 sm:$0xff]   ;;  %v1225_v10 = vld [vmem:[#allocation4 + $0x1f0] ss:$8 sps:$4 sm:$0xff]  }
  0x50   :  { %674 = vmatpush1.bf16.msra.mxu1 %v1161_v28  ;;  %v1228_v11 = vld [vmem:[#allocation6 + $0x40] sm:$0xff]   ;;  %v1324_v12 = vmov 1966171168   ;;  %v231_v16 = vshrl.u32 %v230_v14, 7 }
  0x51   :  { %711 = vmatpush1.bf16.msra.mxu0 %v1152_v24  ;;  %675 = vmatprep.subr.bf16.mxu1 %v1162_v30  ;;  %v228_v13 = vunpack.c.l.s4 %v1324_v12  ;;  %v998_v17 = vld.sshfl [vmem:[%s1446_s2] sm:$0x33 pattern:$0x75316420] }
  0x52   :  { %712 = vmatprep.subr.bf16.mxu0 %v1160_v27  ;;  %v226_v19 = vcombine.high %v998_v17, %v998_v17  ;;  %v1415_v23 = vsub.s32 0, %v231_v16 }
  0x53   :  { %v229_v15 = vunpack.c.0.s8 %v228_v13 }
  0x54   :  { %676 = vmatpush1.bf16.msra.mxu1 %v1167_v33 }
  0x55   :  { %713 = vmatpush1.bf16.msra.mxu0 %v1158_v29  ;;  %677 = vmatprep.subr.bf16.mxu1 %v1168_v34  ;;  %v1411_v18 = vsub.s32 %v229_v15, %v231_v16 }
  0x56   :  { %714 = vmatprep.subr.bf16.mxu0 %v1166_v31 }
  0x57   :  { %v233_v20 = vrot.slane %v998_v17, %v1411_v18  ;;  %v240_v21 = vrot.slane %v226_v19, %v1411_v18 }
  0x58   :  { %678 = vmatpush1.bf16.msra.mxu1 %v1173_v36 }
  0x59   :  { %715 = vmatpush1.bf16.msra.mxu0 %v1164_v32  ;;  %679 = vmatprep.subr.bf16.mxu1 %v1174_v38  ;;  %v244_v22 = vpack.i.b16 %v233_v20, %v233_v20  ;;  %v251_v24 = vpack.i.b16 %v240_v21, %v240_v21  ;;  %v241_v28 = vcombine.high %v233_v20, %v233_v20 }
  0x5a   :  { %716 = vmatprep.subr.bf16.mxu0 %v1172_v35  ;;  %v242_v31 = vcombine.high %v240_v21, %v240_v21 }
  0x5b   :  { %v249_v27 = vrot.slane %v244_v22, %v1415_v23  ;;  %v256_v30 = vrot.slane %v251_v24, %v1415_v23  ;;  %v258_v36 = vpack.i.b16 %v241_v28, %v241_v28 }
  0x5c   :  { %680 = vmatpush1.bf16.msra.mxu1 %v1179_v41  ;;  %v265_v38 = vpack.i.b16 %v242_v31, %v242_v31  ;;  %v1229_v41 = vld [vmem:[#allocation6] sm:$0xff]  }
  0x5d   :  { %717 = vmatpush1.bf16.msra.mxu0 %v1170_v37  ;;  %681 = vmatprep.subr.bf16.mxu1 %v1180_v42 }
  0x5e   :  { %718 = vmatprep.subr.bf16.mxu0 %v1178_v39 }
  0x60   :  { %682 = vmatpush1.bf16.msra.mxu1 %v1185_v44 }
  0x61   :  { %719 = vmatpush1.bf16.msra.mxu0 %v1176_v40  ;;  %683 = vmatprep.subr.bf16.mxu1 %v1186_v46 }
  0x62   :  { %720 = vmatprep.subr.bf16.mxu0 %v1184_v43  ;;  %v263_v43 = vrot.slane %v258_v36, %v1415_v23 }
  0x64   :  { %684 = vmatpush1.bf16.msra.mxu1 %v1191_v48 }
  0x65   :  { %721 = vmatpush1.bf16.msra.mxu0 %v1182_v45  ;;  %685 = vmatprep.subr.bf16.mxu1 %v1192_v50  ;;  %v1230_v45 = vld [vmem:[#allocation6 + $0x48] sm:$0xff]  }
  0x66   :  { %722 = vmatprep.subr.bf16.mxu0 %v1190_v47  ;;  %v270_v47 = vrot.slane %v265_v38, %v1415_v23 }
  0x68   :  { %686 = vmatpush1.bf16.msra.mxu1 %v1197_v52 }
  0x69   :  { %723 = vmatpush1.bf16.msra.mxu0 %v1188_v49  ;;  %687 = vmatprep.subr.bf16.mxu1 %v1198_v54 }
  0x6a   :  { %724 = vmatprep.subr.bf16.mxu0 %v1196_v51  ;;  %v1231_v51 = vld [vmem:[#allocation6 + $0x8] sm:$0xff]  }
  0x6c   :  { %688 = vmatpush1.bf16.msra.mxu1 %v1203_v56  ;;  %v1233_v56 = vld [vmem:[#allocation6 + $0x10] sm:$0xff]  }
  0x6d   :  { %725 = vmatpush1.bf16.msra.mxu0 %v1194_v53  ;;  %689 = vmatprep.subr.bf16.mxu1 %v1204_v58  ;;  %v1232_v53 = vld [vmem:[#allocation6 + $0x50] sm:$0xff]   ;;  %v1234_v58 = vld [vmem:[#allocation6 + $0x58] sm:$0xff]  }
  0x6e   :  { %726 = vmatprep.subr.bf16.mxu0 %v1202_v55 }
  0x70   :  { %690 = vmatpush1.bf16.msra.mxu1 %v1209_v61  ;;  %v1237_v61 = vld [vmem:[#allocation6 + $0x20] sm:$0xff]  }
  0x71   :  { %727 = vmatpush1.bf16.msra.mxu0 %v1200_v57  ;;  %691 = vmatprep.subr.bf16.mxu1 %v1210_v62  ;;  %v1238_v62 = vld [vmem:[#allocation6 + $0x68] sm:$0xff]  }
  0x72   :  { %728 = vmatprep.subr.bf16.mxu0 %v1208_v59  ;;  %v1235_v59 = vld [vmem:[#allocation6 + $0x18] sm:$0xff]  }
  0x74   :  { %692 = vmatpush1.bf16.msra.mxu1 %v1215_v2  ;;  %v1241_v2 = vld [vmem:[#allocation6 + $0x30] sm:$0xff]  }
  0x75   :  { %729 = vmatpush1.bf16.msra.mxu0 %v1206_v60  ;;  %693 = vmatprep.subr.bf16.mxu1 %v1216_v3  ;;  %v1236_v60 = vld [vmem:[#allocation6 + $0x60] sm:$0xff]   ;;  %v1242_v3 = vld [vmem:[#allocation6 + $0x78] sm:$0xff]  }
  0x76   :  { %730 = vmatprep.subr.bf16.mxu0 %v1214_v63  ;;  %v1239_v63 = vld [vmem:[#allocation6 + $0x28] sm:$0xff]  }
  0x78   :  { %694 = vmatpush1.bf16.msra.mxu1 %v1221_v6 }
  0x79   :  { %731 = vmatpush1.bf16.msra.mxu0 %v1212_v1  ;;  %1082 = vmatprep.subr.bf16.mxu1 %v1228_v11  ;;  %v1240_v1 = vld [vmem:[#allocation6 + $0x70] sm:$0xff]  }
  0x7a   :  { %732 = vmatprep.subr.bf16.mxu0 %v1220_v5  ;;  %v1063_v5 = vld.sshfl [vmem:[%s1448_s4] sm:$0x11 pattern:$0x75316420] }
  0x7b   :  { %v767_v11 = vrot.slane %v1063_v5, %v1411_v18 }
  0x7d   :  { %733 = vmatpush1.bf16.msra.mxu0 %v1218_v4  ;;  %v1243_v4 = vld [vmem:[#allocation6 + $0x38] sm:$0xff]   ;;  %v776_v13 = vpack.i.b16 %v767_v11, %v767_v11 }
  0x7e   :  { %734 = vmatprep.subr.bf16.mxu0 %v1224_v7  ;;  %v760_v7 = vcombine.high %v1063_v5, %v1063_v5 }
  0x7f   :  { %v781_v22 = vrot.slane %v776_v13, %v1415_v23 }
  0x80   :  { %v774_v12 = vrot.slane %v760_v7, %v1411_v18 }
  0x81   :  { %735 = vmatpush1.bf16.msra.mxu0 %v1222_v8 }
  0x82   :  { %736 = vmatprep.subr.bf16.mxu0 %v1227_v9  ;;  %v783_v15 = vpack.i.b16 %v774_v12, %v774_v12 }
  0x85   :  { %737 = vmatpush1.bf16.msra.mxu0 %v1225_v10 }
 0x113   :  { %v161_v25 = vpop.f32.mrb[0].mxu0 }
 0x114   :  { %v163_v26 = vpop.f32.mrb[1].mxu0 }
 0x115   :  { %v165_v29 = vpop.f32.mrb[2].mxu0 }
 0x116   :  { %v213_v32 = vpack.c.bf16 %v165_v29, %v161_v25  ;;  %v167_v33 = vpop.f32.mrb[3].mxu0 }
 0x117   :  { %v214_v34 = vpack.c.bf16 %v167_v33, %v163_v26  ;;  %v788_v26 = vrot.slane %v783_v15, %v1415_v23 }
 0x118   :  { %v271_v35 = vadd.bf16 %v249_v27, %v213_v32  ;;  %v963_v32 = vld [vmem:[%s1450_s6] sm:$0x1] }
 0x119   :  { %v272_v37 = vadd.bf16 %v256_v30, %v214_v34  ;;  %v965_v34 = vpack.i.b16 %v963_v32, %v963_v32 }
 0x11a   :  { %v275_v44 = vmax.bf16 %v1323_v0, %v271_v35 }
 0x11b   :  { %v204_v39 = vpop.f32.mrb[4].mxu0  ;;  %v276_v40 = vmax.bf16 %v1323_v0, %v272_v37 }
 0x11c   :  { %v206_v42 = vpop.f32.mrb[5].mxu0 }
 0x11d   :  { %v208_v46 = vpop.f32.mrb[6].mxu0  ;;  %695 = vmatprep.mubr.bf16.mxu1 %v276_v40  ;;  %v970_v40 = vrot.slane %v965_v34, %v1415_v23 }
 0x11e   :  { %v215_v48 = vpack.c.bf16 %v208_v46, %v204_v39  ;;  %v210_v49 = vpop.f32.mrb[7].mxu0  ;;  %696 = vmatmul.mubr.bf16.vlgmr.msra.gmra.mrb[0].mxu1 %v275_v44 }
 0x11f   :  { %v216_v50 = vpack.c.bf16 %v210_v49, %v206_v42  ;;  %1083 = vmatpush3.bf16.msra.mxu1 %v1229_v41 }
 0x120   :  { %v273_v52 = vadd.bf16 %v263_v43, %v215_v48  ;;  %1084 = vmatprep.subr.bf16.mxu1 %v1230_v45 }
 0x121   :  { %v274_v54 = vadd.bf16 %v270_v47, %v216_v50 }
 0x122   :  { %v277_v57 = vmax.bf16 %v1323_v0, %v273_v52 }
 0x123   :  { %v278_v55 = vmax.bf16 %v1323_v0, %v274_v54  ;;  %1085 = vmatpush3.bf16.msra.mxu1 %v1231_v51 }
 0x124   :  { %1086 = vmatprep.subr.bf16.mxu1 %v1232_v53 }
 0x125   :  { %738 = vmatprep.mubr.bf16.mxu0 %v278_v55 }
 0x126   :  { %739 = vmatmul.mubr.bf16.vlgmr.msra.gmra.mrb[8].mxu0 %v277_v57 }
 0x127   :  { %1087 = vmatpush3.bf16.msra.mxu1 %v1233_v56 }
 0x128   :  { %1088 = vmatprep.subr.bf16.mxu1 %v1234_v58 }
 0x12b   :  { %1089 = vmatpush3.bf16.msra.mxu1 %v1235_v59 }
 0x12c   :  { %1090 = vmatprep.subr.bf16.mxu1 %v1236_v60 }
 0x12f   :  { %1091 = vmatpush3.bf16.msra.mxu1 %v1237_v61 }
 0x130   :  { %1092 = vmatprep.subr.bf16.mxu1 %v1238_v62 }
 0x133   :  { %1093 = vmatpush3.bf16.msra.mxu1 %v1239_v63 }
 0x134   :  { %1094 = vmatprep.subr.bf16.mxu1 %v1240_v1 }
 0x137   :  { %1095 = vmatpush3.bf16.msra.mxu1 %v1241_v2 }
 0x138   :  { %1096 = vmatprep.subr.bf16.mxu1 %v1242_v3 }
 0x13b   :  { %1097 = vmatpush3.bf16.msra.mxu1 %v1243_v4 }
 0x1f1   :  { %v697_v6 = vpop.f32.mrb[0].mxu1 }
 0x1f2   :  { %v699_v8 = vpop.f32.mrb[1].mxu1 }
 0x1f3   :  { %v701_v9 = vpop.f32.mrb[2].mxu1 }
 0x1f4   :  { %v703_v10 = vpop.f32.mrb[3].mxu1 }
 0x1f9   :  { %v740_v14 = vpop.f32.mrb[8].mxu0 }
 0x1fa   :  { %v741_v16 = vadd.f32 %v740_v14, %v697_v6  ;;  %v742_v17 = vpop.f32.mrb[9].mxu0 }
 0x1fb   :  { %v743_v19 = vadd.f32 %v742_v17, %v699_v8  ;;  %v744_v20 = vpop.f32.mrb[10].mxu0 }
 0x1fc   :  { %v745_v21 = vadd.f32 %v744_v20, %v701_v9  ;;  %v746_v24 = vpop.f32.mrb[11].mxu0 }
 0x1fd   :  { %v747_v25 = vadd.f32 %v746_v24, %v703_v10 }
 0x1fe   :  { %v749_v27 = vpack.c.bf16 %v745_v21, %v741_v16 }
 0x1ff   :  { %v750_v28 = vpack.c.bf16 %v747_v25, %v743_v19 }
 0x200   :  { %v789_v29 = vadd.bf16 %v781_v22, %v749_v27 }
 0x201   :  { %v790_v30 = vadd.bf16 %v788_v26, %v750_v28 }
 0x202   :  { %v791_v31 = vmax.bf16 %v1323_v0, %v789_v29 }
 0x203   :  { %v792_v18 = vmax.bf16 %v1323_v0, %v790_v30 }
 0x205   :  { %953 = vmatprep.mubr.bf16.mxu1 %v792_v18 }
 0x206   :  { %954 = vmatmul.mubr.bf16.vlgmr.msra.gmra.mrb[4].mxu1 %v791_v31 }
 0x2d9   :  { %v1098_v33 = vpop.f32.mrb[4].mxu1 }
 0x2da   :  { %v1099_v35 = vpop.f32.mrb[5].mxu1 }
 0x2db   :  { %v1100_v36 = vadd.f32 %v1099_v35, %v1098_v33  ;;  %v1101_v37 = vpop.f32.mrb[6].mxu1 }
 0x2dc   :  { %v1102_v38 = vpop.f32.mrb[7].mxu1 }
 0x2dd   :  { %v1103_v39 = vadd.f32 %v1102_v38, %v1101_v37 }
 0x2df   :  { %v962_v41 = vpack.c.bf16 %v1103_v39, %v1100_v36 }
 0x2e1   :  { %v971_v42 = vadd.bf16 %v970_v40, %v962_v41 }
 0x2e3   :  { %v1080_v43 = vcombine.low %v971_v42, %v971_v42  ;;  %v1081_v44 = vcombine.high %v971_v42, %v971_v42 }
 0x2e5   :  { %979 = vst [vmem:[%s1451_s7] sm:$0xf] %v1080_v43  ;;  %980 = vst [vmem:[%s1451_s7 + $0x4] sm:$0xf] %v1081_v44 }
 0x2e6   :  { %985 = vsyncpa [#allocation3], 1 }
 0x2e7   :  { %986 = vsyncpa [#allocation5], 1 }

</bundles_post_ra>
